<compile_context>
chip_gen: v6e
topology: v6e:2x2x1
jax: 0.10.0
libtpu: 0.0.40
codegen_flags: <defaults>
</compile_context>

<pallas_src>
import math
from functools import partial

import jax
import jax.numpy as jnp
from jax import lax
from jax.experimental import pallas as pl
from jax.experimental.pallas import tpu as pltpu


def _round_up(x, m):
    return ((x + m - 1) // m) * m


# ---------------------------------------------------------------------------
# Pass 1: L2 normalize rows once (and cast to the MXU input dtype).
# ---------------------------------------------------------------------------
def _normalize_kernel(f_ref, o_ref, *, eps):
    f = f_ref[...].astype(jnp.float32)
    sumsq = jnp.sum(f * f, axis=-1, keepdims=True)
    # F.normalize(p=2, eps): x / max(||x||, eps) == x * rsqrt(max(sumsq, eps^2))
    inv = lax.rsqrt(jnp.maximum(sumsq, jnp.float32(eps * eps)))
    o_ref[...] = (f * inv).astype(o_ref.dtype)


# ---------------------------------------------------------------------------
# Pass 2: tiled Gram + exp + masked row reductions (flash-style accumulators).
# ---------------------------------------------------------------------------
def _fold_lanes(x):
    """(TM, TN) f32 -> (TM, 128): sum lane-aligned 128-wide chunks on the VPU."""
    acc = x[:, 0:128]
    for k in range(1, x.shape[1] // 128):
        acc = acc + x[:, k * 128:(k + 1) * 128]
    return acc


def _supcon_tile_kernel(rowf_ref, colf_ref, labc_ref, labr_ref, out_ref,
                        pos_acc, neg_acc, *, inv_temp, pad_correction,
                        block_m, block_n):
    i = pl.program_id(0)
    j = pl.program_id(1)
    nj = pl.num_programs(1)

    @pl.when(j == 0)
    def _init():
        pos_acc[...] = jnp.zeros_like(pos_acc)
        neg_acc[...] = jnp.zeros_like(neg_acc)

    # MXU: (TM, D) @ (TN, D)^T contracted on the feature dim, f32 accumulation.
    # Mosaic lowers the dim-1 contraction via the transposed-rhs matmul path,
    # so no per-tile XLU transpose of the column tile is needed.
    gram = lax.dot_general(
        rowf_ref[...], colf_ref[...],
        (((1,), (1,)), ((), ())),
        preferred_element_type=jnp.float32,
    )
    # Normalized similarities are <= ~1, so exp((s - 1)/T) never overflows; the
    # constant shift cancels exactly in log(neg) - log(pos).
    sim = jnp.exp(gram * inv_temp - inv_temp)

    # neg_sim: unconditional full sum (includes the diagonal, like the
    # reference).  Padded columns contribute exactly exp(-1/T) each (padded
    # feature rows normalize to exact zero vectors); that constant is removed
    # once at finalize, so no per-element column mask is needed.
    neg_acc[...] += _fold_lanes(sim)

    # positives: same label.  Padded columns carry a sentinel label so they
    # can never match; the diagonal exclusion needs iotas only on tiles whose
    # row range overlaps the column range.
    label_eq = labc_ref[...] == labr_ref[...]
    row_lo = i * block_m
    col_lo = j * block_n
    diag_overlap = (row_lo < col_lo + block_n) & (col_lo < row_lo + block_m)

    @pl.when(diag_overlap)
    def _diag_tile():
        row_idx = row_lo + lax.broadcasted_iota(jnp.int32, (block_m, block_n), 0)
        col_idx = col_lo + lax.broadcasted_iota(jnp.int32, (block_m, block_n), 1)
        mask = label_eq & (row_idx != col_idx)
        pos_acc[...] += _fold_lanes(jnp.where(mask, sim, 0.0))

    @pl.when(jnp.logical_not(diag_overlap))
    def _interior_tile():
        pos_acc[...] += _fold_lanes(jnp.where(label_eq, sim, 0.0))

    @pl.when(j == nj - 1)
    def _finalize():
        # One XLU lane-reduce per row tile, padded-column correction, then
        # -log(pos/neg) == log(neg) - log(pos): EUP logs, no full-width divide.
        neg = jnp.sum(neg_acc[...], axis=1, keepdims=True) - jnp.float32(pad_correction)
        pos = jnp.sum(pos_acc[...], axis=1, keepdims=True)
        out_ref[...] = jnp.log(neg) - jnp.log(pos)


# ---------------------------------------------------------------------------
# Wrapper
# ---------------------------------------------------------------------------
def _device_tuning():
    """Per-generation (block_m, block_n, vmem_limit_bytes, want_two_row_tiles)."""
    kind = ""
    try:
        kind = jax.devices()[0].device_kind.lower()
    except Exception:
        pass
    if "v7" in kind:
        # 64 MiB VMEM per TC, 2 TCs: moderate tiles, keep >= 2 row tiles.
        return 512, 256, 48 * 1024 * 1024, True
    if "v6" in kind:
        # 128 MiB VMEM, roofline knee at block_m ~640: big row tiles.
        return 1024, 256, 96 * 1024 * 1024, False
    # v5e / unknown: VALU/vst saturate before HBM at block_m=256; keep moderate.
    return 256, 256, 48 * 1024 * 1024, False


def supcon_loss(features, labels, temperature=0.1, *,
                block_m=None, block_n=None, dot_dtype=jnp.bfloat16, eps=1e-6):
    """features: (B, D) float, labels: (B,) int. Returns scalar float32 loss."""
    B, D = features.shape
    labels = labels.astype(jnp.int32).reshape(B)

    def_bm, def_bn, vmem_limit, want_two_row_tiles = _device_tuning()
    block_m = def_bm if block_m is None else block_m
    block_n = def_bn if block_n is None else block_n

    # Lane/sublane-aligned padding; keep both tile dims multiples of 128
    # (block_n feeds the label-row lane dim; both are MXU-friendly M/N).
    Dp = _round_up(D, 128)
    bp0 = _round_up(B, 128)
    block_m = min(block_m, bp0)
    block_n = min(block_n, bp0)
    # v7x megacore: make sure the "parallel" row axis has >= 2 tiles.
    if want_two_row_tiles and bp0 // block_m < 2 and bp0 >= 256:
        block_m = max(128, ((bp0 // 2) // 128) * 128)
    assert block_m % 128 == 0 and block_n % 128 == 0
    Bp = _round_up(B, math.lcm(block_m, block_n))
    n_pad = Bp - B

    f_pad = jnp.pad(features, ((0, n_pad), (0, Dp - D)))
    # Sentinel label strictly smaller than every real label: padded columns can
    # never be counted as positives, no per-element column-validity mask needed.
    sentinel = jnp.min(labels) - 1
    lab_pad = jnp.concatenate(
        [labels, jnp.full((n_pad,), sentinel, dtype=jnp.int32)])
    lab_col = lab_pad.reshape(Bp, 1)
    lab_row = lab_pad.reshape(1, Bp)

    inv_temp = float(1.0 / temperature)
    # Each padded column contributes exactly exp((0 - 1)/T) to every row's neg.
    pad_correction = float(n_pad) * math.exp(-inv_temp)

    # Pass 1: normalize once, cast once.
    fn = pl.pallas_call(
        partial(_normalize_kernel, eps=eps),
        out_shape=jax.ShapeDtypeStruct((Bp, Dp), dot_dtype),
        grid=(Bp // block_m,),
        in_specs=[pl.BlockSpec((block_m, Dp), lambda i: (i, 0))],
        out_specs=pl.BlockSpec((block_m, Dp), lambda i: (i, 0)),
        compiler_params=pltpu.CompilerParams(
            dimension_semantics=("parallel",),
            vmem_limit_bytes=vmem_limit),
    )(f_pad)

    # Pass 2: tiled Gram / exp / masked reductions.
    # TODO(synk): if profiling shows exposed DMA at small D, add
    # pipeline_mode=pl.Buffered(3) on the column-feature BlockSpec.
    grid = (Bp // block_m, Bp // block_n)
    loss_rows = pl.pallas_call(
        partial(_supcon_tile_kernel,
                inv_temp=inv_temp, pad_correction=pad_correction,
                block_m=block_m, block_n=block_n),
        out_shape=jax.ShapeDtypeStruct((Bp, 1), jnp.float32),
        grid=grid,
        in_specs=[
            pl.BlockSpec((block_m, Dp), lambda i, j: (i, 0)),   # row feature tile
            pl.BlockSpec((block_n, Dp), lambda i, j: (j, 0)),   # col feature tile
            pl.BlockSpec((block_m, 1), lambda i, j: (i, 0)),    # labels (col vec)
            pl.BlockSpec((1, block_n), lambda i, j: (0, j)),    # labels (row vec)
        ],
        out_specs=pl.BlockSpec((block_m, 1), lambda i, j: (i, 0)),
        scratch_shapes=[pltpu.VMEM((block_m, 128), jnp.float32),   # pos (lane-dense)
                        pltpu.VMEM((block_m, 128), jnp.float32)],  # neg (lane-dense)
        compiler_params=pltpu.CompilerParams(
            dimension_semantics=("parallel", "arbitrary"),
            vmem_limit_bytes=vmem_limit),
    )(fn, fn, lab_col, lab_row)

    # Mean over real rows only (padded rows are dropped), done in the wrapper.
    valid = (jnp.arange(Bp) < B).reshape(Bp, 1)
    return jnp.sum(jnp.where(valid, loss_rows, 0.0)) / jnp.float32(B)


def supcon_loss_ref(features, labels, temperature=0.1):
    """Pure-JAX reference mirroring the PyTorch module."""
    f = features.astype(jnp.float32)
    norm = jnp.maximum(jnp.linalg.norm(f, axis=-1, keepdims=True), 1e-6)
    fn = f / norm
    sim = jnp.exp(fn @ fn.T / temperature)
    lab = labels.reshape(-1, 1)
    mask = (lab == lab.T).astype(jnp.float32)
    mask = mask * (1.0 - jnp.eye(f.shape[0], dtype=jnp.float32))
    pos = (sim * mask).sum(axis=1)
    neg = sim.sum(axis=1)
    return -jnp.log(pos / neg).mean()


if __name__ == "__main__":
    key = jax.random.PRNGKey(0)
    k1, k2 = jax.random.split(key)

    # Test 1: the module's toy scale (pads to a single 128x128 tile).
    B, D = 8, 32
    features = jax.random.normal(k1, (B, D), dtype=jnp.float32)
    labels = jnp.array([0, 0, 1, 1, 2, 2, 3, 3], dtype=jnp.int32)  # >=1 positive/row
    loss = supcon_loss(features, labels, temperature=0.1)
    jax.block_until_ready(loss)
    ref = supcon_loss_ref(features, labels, temperature=0.1)
    # bf16 MXU inputs (f32 accumulation): loose-but-meaningful tolerance.
    assert jnp.allclose(loss, ref, rtol=3e-2, atol=3e-2), (loss, ref)

    # Test 2: non-aligned B, D with forced small tiles -> exercises the 2x2
    # grid (interior + diagonal tiles), sentinel-label padding, and the
    # padded-column neg correction.
    B2, D2 = 200, 96
    f2 = jax.random.normal(k2, (B2, D2), dtype=jnp.float32)
    l2 = (jnp.arange(B2) % 7).astype(jnp.int32)   # every class has many positives
    loss2 = supcon_loss(f2, l2, temperature=0.1, block_m=128, block_n=128)
    jax.block_until_ready(loss2)
    ref2 = supcon_loss_ref(f2, l2, temperature=0.1)
    assert jnp.allclose(loss2, ref2, rtol=3e-2, atol=3e-2), (loss2, ref2)

    print("KERNEL_OK")
</pallas_src>

<mosaic_0001>
module attributes {stable_mosaic.version = 11 : i64} {
  func.func @_normalize_kernel(%arg0: i32, %arg1: memref<128x128xf32, #tpu.memory_space<vmem>>, %arg2: memref<128x128xbf16, #tpu.memory_space<vmem>>) attributes {dimension_semantics = [#tpu.dimension_semantics<parallel>], iteration_bounds = array<i64: 1>, scalar_prefetch = 0 : i64, scratch_operands = 0 : i64, tpu.core_type = #tpu.core_type<tc>, window_params = [{transform_indices = @transform_0, window_bounds = array<i64: 128, 128>}, {transform_indices = @transform_1, window_bounds = array<i64: 128, 128>}]} {
    %c0 = arith.constant 0 : index
    %c0_0 = arith.constant 0 : index
    %0 = vector.load %arg1[%c0, %c0_0] : memref<128x128xf32, #tpu.memory_space<vmem>>, vector<128x128xf32>
    %1 = arith.mulf %0, %0 : vector<128x128xf32>
    %cst = arith.constant dense<0.000000e+00> : vector<128xf32>
    %2 = vector.multi_reduction <add>, %1, %cst [1] : vector<128x128xf32> to vector<128xf32>
    %3 = vector.shape_cast %2 : vector<128xf32> to vector<128x1xf32>
    %cst_1 = arith.constant 9.99999996E-13 : f32
    %4 = vector.broadcast %cst_1 : f32 to vector<128x1xf32>
    %5 = arith.maximumf %3, %4 : vector<128x1xf32>
    %6 = math.rsqrt %5 : vector<128x1xf32>
    %7 = vector.broadcast %6 : vector<128x1xf32> to vector<128x128xf32>
    %8 = arith.mulf %0, %7 : vector<128x128xf32>
    %9 = arith.truncf %8 : vector<128x128xf32> to vector<128x128xbf16>
    %c0_2 = arith.constant 0 : index
    %c0_3 = arith.constant 0 : index
    %10 = vector.load %arg2[%c0_2, %c0_3] : memref<128x128xbf16, #tpu.memory_space<vmem>>, vector<128x128xbf16>
    tpu.vector_store %arg2[%c0_2, %c0_3], %9 {strides = array<i32>} : memref<128x128xbf16, #tpu.memory_space<vmem>>, vector<128x128xbf16>,
    return
  }
  func.func @transform_0(%arg0: i32) -> (i32, i32) {
    %c0_i32 = arith.constant 0 : i32
    %c0_i32_0 = arith.constant 0 : i32
    return %arg0, %c0_i32 : i32, i32
  }
  func.func @transform_1(%arg0: i32) -> (i32, i32) {
    %c0_i32 = arith.constant 0 : i32
    %c0_i32_0 = arith.constant 0 : i32
    return %arg0, %c0_i32 : i32, i32
  }
}

</mosaic_0001>

<bundles_post_ra>
// kernel: tpu_custom_call.1
= control target key start
LH: loop header
LB: loop body
LE: loop exit
PB: predicated region body
PF: predicated region fallthrough
CT: control target
= control target key end

     0   :  { %6 = vsyncpa [#allocation3], 0  ;;  %s495_s0 = inlined_call_operand.hbm [shape: f32[128,128], index: 0, kind: input, shape index: {}]   ;;  %s496_s1 = inlined_call_operand.hbm [shape: bf16[128,128], index: 1, kind: output, shape index: {}]  }
   0x1   :  { %7 = vsyncpa [#allocation4], 0  ;;  %s393_s6 = smov [#allocation2]  }
   0x2   :  { %s13_s7 = sshll.u32 %s393_s6, 4  ;;  %s14_s7 = int_to_ptr.vmem [resolvable:$true] %s13_s7 }
   0x3   :  { %s357_s8 = scalar_lea.vmem %s14_s7, 2048  ;;  %p362_p1 = scmp.lt.s32.totalorder %s14_s7, %s14_s7 }
   0x4   :  { %p358_p0 = scmp.ne.s32.totalorder %s14_s7, %s357_s8  ;;  %p363_p2 = scmp.lt.s32.totalorder %s357_s8, %s357_s8 }
   0x6   :  { %p364_p3 = por %p363_p2, %p362_p1 }
   0x8   :  { %p365_p4 = pnand %p364_p3, %p358_p0 }
   0xa   :  { %368 = shalt.err (!%p365_p4)
}
   0xb   :  { %s394_s9 = smov 128   ;;  %s395_s10 = smov 8  }
   0xc   :  { %19 = dma.hbm_to_vmem [thread:$0]  %s495_s0, 2048, %s14_s7, [#allocation3], %s394_s9, %s394_s9, %s395_s10  }
   0xd   :  { %389 = dma.done.wait [#allocation3], 2048  }
   0xe   :  { %390 = vsyncadd [#allocation3], 4294965248  ;;  %v412_v0 = vld [vmem:[#allocation2 + $0x10] sm:$0xff]  ;;  %v414_v1 = vld [vmem:[#allocation2] sm:$0xff]  ;;  %s396_s0 = smov [#allocation5]  }
   0xf   :  { %v416_v2 = vld [vmem:[#allocation2 + $0x18] sm:$0xff]  ;;  %v41_v3 = vmul.f32 %v412_v0, %v412_v0  ;;  %v39_v4 = vmul.f32 %v414_v1, %v414_v1  ;;  %v422_v5 = vld [vmem:[#allocation2 + $0x8] sm:$0xff]  ;;  %v430_v9 = vld [vmem:[#allocation2 + $0x20] sm:$0xff]  ;;  %s220_s13 = sshll.u32 %s396_s0, 4  ;;  %s221_s13 = int_to_ptr.vmem [resolvable:$true] %s220_s13 }
  0x10   :  { %v42_v6 = vmul.f32 %v416_v2, %v416_v2  ;;  %v40_v7 = vmul.f32 %v422_v5, %v422_v5  ;;  %v428_v8 = vld [vmem:[#allocation2 + $0x28] sm:$0xff]  ;;  %v43_v11 = vmul.f32 %v430_v9, %v430_v9  ;;  %v436_v12 = vld [vmem:[#allocation2 + $0x38] sm:$0xff]  ;;  %v438_v13 = vld [vmem:[#allocation2 + $0x30] sm:$0xff]  ;;  %s369_s14 = scalar_lea.vmem %s221_s13, 1024  ;;  %p374_p6 = scmp.lt.s32.totalorder %s221_s13, %s221_s13 }
  0x11   :  { %59 = vadd.xlane.f32.xlu1 %v41_v3  ;;  %55 = vadd.xlane.f32.xlu0 %v39_v4  ;;  %v44_v10 = vmul.f32 %v428_v8, %v428_v8  ;;  %v46_v14 = vmul.f32 %v436_v12, %v436_v12  ;;  %v45_v15 = vmul.f32 %v438_v13, %v438_v13  ;;  %v444_v16 = vld [vmem:[#allocation2 + $0x48] sm:$0xff]  ;;  %v446_v17 = vld [vmem:[#allocation2 + $0x40] sm:$0xff]  ;;  %v452_v20 = vld [vmem:[#allocation2 + $0x58] sm:$0xff]  ;;  %p370_p5 = scmp.ne.s32.totalorder %s221_s13, %s369_s14  ;;  %p375_p7 = scmp.lt.s32.totalorder %s369_s14, %s369_s14 }
  0x12   :  { %v48_v18 = vmul.f32 %v444_v16, %v444_v16  ;;  %v47_v19 = vmul.f32 %v446_v17, %v446_v17  ;;  %v454_v21 = vld [vmem:[#allocation2 + $0x50] sm:$0xff]  ;;  %v50_v22 = vmul.f32 %v452_v20, %v452_v20  ;;  %v460_v24 = vld [vmem:[#allocation2 + $0x68] sm:$0xff]  ;;  %v462_v25 = vld [vmem:[#allocation2 + $0x60] sm:$0xff] }
  0x13   :  { %v49_v23 = vmul.f32 %v454_v21, %v454_v21  ;;  %v52_v26 = vmul.f32 %v460_v24, %v460_v24  ;;  %v51_v27 = vmul.f32 %v462_v25, %v462_v25  ;;  %v468_v28 = vld [vmem:[#allocation2 + $0x78] sm:$0xff]  ;;  %v470_v29 = vld [vmem:[#allocation2 + $0x70] sm:$0xff]  ;;  %p376_p8 = por %p375_p7, %p374_p6 }
  0x14   :  { %v54_v30 = vmul.f32 %v468_v28, %v468_v28  ;;  %v53_v31 = vmul.f32 %v470_v29, %v470_v29 }
  0x15   :  { %61 = vadd.xlane.f32.xlu1 %v42_v6  ;;  %57 = vadd.xlane.f32.xlu0 %v40_v7  ;;  %p377_p9 = pnand %p376_p8, %p370_p5 }
  0x19   :  { %65 = vadd.xlane.f32.xlu1 %v44_v10  ;;  %63 = vadd.xlane.f32.xlu0 %v43_v11 }
  0x1d   :  { %69 = vadd.xlane.f32.xlu1 %v46_v14  ;;  %67 = vadd.xlane.f32.xlu0 %v45_v15 }
  0x21   :  { %73 = vadd.xlane.f32.xlu1 %v48_v18  ;;  %71 = vadd.xlane.f32.xlu0 %v47_v19 }
  0x25   :  { %77 = vadd.xlane.f32.xlu1 %v50_v22  ;;  %75 = vadd.xlane.f32.xlu0 %v49_v23 }
  0x29   :  { %81 = vadd.xlane.f32.xlu1 %v52_v26  ;;  %79 = vadd.xlane.f32.xlu0 %v51_v27 }
  0x2d   :  { %85 = vadd.xlane.f32.xlu1 %v54_v30  ;;  %83 = vadd.xlane.f32.xlu0 %v53_v31 }
  0x9a   :  { %v60_v32 = vpop.xlane.xlu1 %59  ;;  %v56_v33 = vpop.xlane.xlu0 %55 }
  0x9b   :  { %v89_v34 = vmax.f32 %v60_v32, 1e-12  ;;  %v87_v35 = vmax.f32 %v56_v33, 1e-12 }
  0x9d   :  { %317 = vrsqrt.f32 %v89_v34 }
  0x9e   :  { %v62_v36 = vpop.xlane.xlu1 %61  ;;  %v58_v37 = vpop.xlane.xlu0 %57  ;;  %319 = vrsqrt.f32 %v87_v35 }
  0x9f   :  { %v90_v38 = vmax.f32 %v62_v36, 1e-12  ;;  %v88_v39 = vmax.f32 %v58_v37, 1e-12 }
  0xa1   :  { %321 = vrsqrt.f32 %v90_v38 }
  0xa2   :  { %323 = vrsqrt.f32 %v88_v39  ;;  %v66_v40 = vpop.xlane.xlu1 %65  ;;  %v64_v41 = vpop.xlane.xlu0 %63 }
  0xa3   :  { %v92_v42 = vmax.f32 %v66_v40, 1e-12  ;;  %v91_v43 = vmax.f32 %v64_v41, 1e-12 }
  0xa5   :  { %325 = vrsqrt.f32 %v92_v42 }
  0xa6   :  { %327 = vrsqrt.f32 %v91_v43  ;;  %v70_v44 = vpop.xlane.xlu1 %69  ;;  %v68_v45 = vpop.xlane.xlu0 %67 }
  0xa7   :  { %v94_v46 = vmax.f32 %v70_v44, 1e-12  ;;  %v93_v47 = vmax.f32 %v68_v45, 1e-12 }
  0xa9   :  { %329 = vrsqrt.f32 %v94_v46 }
  0xaa   :  { %331 = vrsqrt.f32 %v93_v47  ;;  %v74_v48 = vpop.xlane.xlu1 %73  ;;  %v72_v49 = vpop.xlane.xlu0 %71 }
  0xab   :  { %v96_v50 = vmax.f32 %v74_v48, 1e-12  ;;  %v95_v51 = vmax.f32 %v72_v49, 1e-12  ;;  %v318_v52 = vpop.eup %317 }
  0xac   :  { %v320_v53 = vpop.eup %319  ;;  %v121_v58 = vmul.f32 %v318_v52, %v412_v0 }
  0xad   :  { %333 = vrsqrt.f32 %v96_v50  ;;  %v119_v62 = vmul.f32 %v320_v53, %v414_v1 }
  0xae   :  { %v322_v54 = vpop.eup %321  ;;  %335 = vrsqrt.f32 %v95_v51  ;;  %v78_v55 = vpop.xlane.xlu1 %77 }
  0xaf   :  { %v76_v56 = vpop.xlane.xlu0 %75  ;;  %v324_v57 = vpop.eup %323  ;;  %v122_v59 = vmul.f32 %v322_v54, %v416_v2  ;;  %v98_v60 = vmax.f32 %v78_v55, 1e-12 }
  0xb0   :  { %v97_v61 = vmax.f32 %v76_v56, 1e-12  ;;  %v120_v63 = vmul.f32 %v324_v57, %v422_v5 }
  0xb1   :  { %v272_v3 = vpack.c.bf16 %v122_v59, %v121_v58  ;;  %337 = vrsqrt.f32 %v98_v60 }
  0xb2   :  { %v326_v4 = vpop.eup %325  ;;  %v267_v6 = vpack.c.bf16 %v120_v63, %v119_v62  ;;  %339 = vrsqrt.f32 %v97_v61  ;;  %v82_v7 = vpop.xlane.xlu1 %81 }
  0xb3   :  { %v80_v10 = vpop.xlane.xlu0 %79  ;;  %v328_v11 = vpop.eup %327  ;;  %304 = vst [vmem:[#allocation5 + $0x8] sm:$0xff] %v272_v3   ;;  %v124_v14 = vmul.f32 %v326_v4, %v428_v8  ;;  %v100_v0 = vmax.f32 %v82_v7, 1e-12 }
  0xb4   :  { %v99_v15 = vmax.f32 %v80_v10, 1e-12  ;;  %268 = vst [vmem:[#allocation5] sm:$0xff] %v267_v6   ;;  %v123_v2 = vmul.f32 %v328_v11, %v430_v9 }
  0xb5   :  { %341 = vrsqrt.f32 %v100_v0 }
  0xb6   :  { %v330_v1 = vpop.eup %329  ;;  %v277_v18 = vpack.c.bf16 %v124_v14, %v123_v2  ;;  %343 = vrsqrt.f32 %v99_v15  ;;  %v86_v5 = vpop.xlane.xlu1 %85 }
  0xb7   :  { %v84_v19 = vpop.xlane.xlu0 %83  ;;  %v332_v22 = vpop.eup %331  ;;  %v126_v23 = vmul.f32 %v330_v1, %v436_v12  ;;  %v102_v26 = vmax.f32 %v86_v5, 1e-12 }
  0xb8   :  { %v101_v27 = vmax.f32 %v84_v19, 1e-12  ;;  %305 = vst [vmem:[#allocation5 + $0x10] sm:$0xff] %v277_v18   ;;  %v125_v30 = vmul.f32 %v332_v22, %v438_v13 }
  0xb9   :  { %345 = vrsqrt.f32 %v102_v26 }
  0xba   :  { %v334_v8 = vpop.eup %333  ;;  %v282_v31 = vpack.c.bf16 %v126_v23, %v125_v30  ;;  %347 = vrsqrt.f32 %v101_v27 }
  0xbb   :  { %v336_v32 = vpop.eup %335  ;;  %v128_v9 = vmul.f32 %v334_v8, %v444_v16 }
  0xbc   :  { %306 = vst [vmem:[#allocation5 + $0x18] sm:$0xff] %v282_v31   ;;  %v127_v33 = vmul.f32 %v336_v32, %v446_v17 }
  0xbe   :  { %v338_v34 = vpop.eup %337  ;;  %v287_v35 = vpack.c.bf16 %v128_v9, %v127_v33 }
  0xbf   :  { %v340_v36 = vpop.eup %339  ;;  %v130_v12 = vmul.f32 %v338_v34, %v452_v20 }
  0xc0   :  { %307 = vst [vmem:[#allocation5 + $0x20] sm:$0xff] %v287_v35   ;;  %v129_v37 = vmul.f32 %v340_v36, %v454_v21 }
  0xc2   :  { %v342_v38 = vpop.eup %341  ;;  %v292_v13 = vpack.c.bf16 %v130_v12, %v129_v37 }
  0xc3   :  { %v344_v39 = vpop.eup %343  ;;  %v132_v40 = vmul.f32 %v342_v38, %v460_v24 }
  0xc4   :  { %308 = vst [vmem:[#allocation5 + $0x28] sm:$0xff] %v292_v13   ;;  %v131_v41 = vmul.f32 %v344_v39, %v462_v25 }
  0xc6   :  { %v346_v16 = vpop.eup %345  ;;  %v297_v42 = vpack.c.bf16 %v132_v40, %v131_v41 }
  0xc7   :  { %v348_v17 = vpop.eup %347  ;;  %v134_v43 = vmul.f32 %v346_v16, %v468_v28 }
  0xc8   :  { %309 = vst [vmem:[#allocation5 + $0x30] sm:$0xff] %v297_v42   ;;  %v133_v20 = vmul.f32 %v348_v17, %v470_v29 }
  0xca   :  { %v302_v21 = vpack.c.bf16 %v134_v43, %v133_v20 }
  0xcc   :  { %310 = vst [vmem:[#allocation5 + $0x38] sm:$0xff] %v302_v21  }
  0xcd   :  { %380 = shalt.err (!%p377_p9)
}
  0xce   :  { %s397_s15 = smov 64   ;;  %s398_s16 = smov 4  }
  0xcf   :  { %226 = dma.vmem_to_hbm [thread:$0]  %s221_s13, 1024, %s496_s1, [#allocation4], %s397_s15, %s397_s15, %s398_s16  }
  0xd0   :  { %391 = dma.done.wait [#allocation4], 1024  }
  0xd1   :  { %392 = vsyncadd [#allocation4], 4294966272 }
  0xd2   :  { %230 = vsyncpa [#allocation3], 1 }
  0xd3   :  { %231 = vsyncpa [#allocation4], 1 }

</bundles_post_ra>
